<compile_context>
chip_gen: v5e
topology: v5e:2x2
jax: 0.10.0
libtpu: 0.0.40
codegen_flags: <defaults>
</compile_context>

<pallas_src>
import math

import jax
import jax.numpy as jnp
from jax.experimental import pallas as pl
from jax.experimental.pallas import tpu as pltpu


def _leaky_relu(x, negative_slope=0.01):
    return jnp.where(x >= 0, x, negative_slope * x)


def _round_up(n, m):
    return ((n + m - 1) // m) * m


def _nbytes(shape, dtype):
    n = 1
    for d in shape:
        n *= int(d)
    return n * jnp.dtype(dtype).itemsize


def _vmem_capacity_bytes():
    try:
        info = pltpu.get_tpu_info()
        cap = getattr(info, "vmem_capacity_bytes", None)
        if cap:
            return int(cap)
    except Exception:
        pass
    return 64 << 20   # conservative default (v7x per-core VMEM)


def discriminator_kernel(x_ref, eb_ref,
                         w1x_ref,
                         w2_ref, b2_ref,
                         w3_ref, b3_ref,
                         w4_ref, b4_ref,
                         w5_ref, b5_ref,
                         o_ref,
                         h2_ref, acc_ref):
    f32 = jnp.float32
    bf16 = jnp.bfloat16
    k = pl.program_id(1)

    # First k-block of this batch tile: layers 1-2 once, stash h2 (bf16), zero acc.
    @pl.when(k == 0)
    def _():
        h1 = _leaky_relu(
            jnp.dot(x_ref[...], w1x_ref[...], preferred_element_type=f32)
            + eb_ref[...].astype(f32))
        h2 = _leaky_relu(
            jnp.dot(h1.astype(bf16), w2_ref[...], preferred_element_type=f32)
            + b2_ref[...])
        h2_ref[...] = h2.astype(bf16)
        acc_ref[...] = jnp.zeros_like(acc_ref)
        # Output block is resident across k; only the last k-step writes the real
        # values.  Zero-init here so intermediate/padded steps never expose garbage.
        o_ref[...] = jnp.zeros_like(o_ref)

    # Layer 3: one N-block of w3; immediately consumed as the matching K-block of
    # layer 4, accumulated in f32.
    h3_blk = _leaky_relu(
        jnp.dot(h2_ref[...], w3_ref[...], preferred_element_type=f32)
        + b3_ref[...])
    acc_ref[...] += jnp.dot(h3_blk.astype(bf16), w4_ref[...],
                            preferred_element_type=f32)

    # Last k-block: finish layer 4, layer 5, numerically-stable sigmoid.
    @pl.when(k == pl.num_programs(1) - 1)
    def _():
        h4 = _leaky_relu(acc_ref[...] + b4_ref[...])
        z = jnp.dot(h4.astype(bf16), w5_ref[...], preferred_element_type=f32) \
            + b5_ref[...]
        ez = jnp.exp(-jnp.abs(z))                       # never overflows
        o_ref[...] = jnp.where(z >= 0, 1.0, ez) / (1.0 + ez)


def init_params(key, features, sequence_len, conditions, embeddings, out_features=1):
    """Deterministic init mirroring the PyTorch module's parameter shapes.

    Weights stored bf16 (matmul operands), biases f32.
    """
    input_size = sequence_len * features
    dims = [input_size + embeddings, 2 * input_size, 4 * input_size,
            8 * input_size, 4 * input_size, out_features]

    keys = jax.random.split(key, 11)
    params = {}
    params["emb"] = jax.random.normal(
        keys[0], (conditions, embeddings), jnp.float32).astype(jnp.bfloat16)

    def linear(kw, kb, fan_in, fan_out):
        bound = 1.0 / math.sqrt(fan_in)
        w = jax.random.uniform(kw, (fan_in, fan_out), jnp.float32, -bound, bound)
        b = jax.random.uniform(kb, (1, fan_out), jnp.float32, -bound, bound)
        return w.astype(jnp.bfloat16), b

    w1, b1 = linear(keys[1], keys[2], dims[0], dims[1])
    params["w1x"] = w1[:input_size]      # (input_size, 2I)
    params["w1e"] = w1[input_size:]      # (embeddings, 2I)
    params["b1"] = b1
    params["w2"], params["b2"] = linear(keys[3], keys[4], dims[1], dims[2])
    params["w3"], params["b3"] = linear(keys[5], keys[6], dims[2], dims[3])
    params["w4"], params["b4"] = linear(keys[7], keys[8], dims[3], dims[4])
    params["w5"], params["b5"] = linear(keys[9], keys[10], dims[4], dims[5])
    return params


def _pad2(a, rows, cols, dtype=None):
    dtype = a.dtype if dtype is None else dtype
    out = jnp.zeros((rows, cols), dtype)
    return out.at[:a.shape[0], :a.shape[1]].set(a.astype(dtype))


def discriminator_fnn(x, condition, params, *, batch_tile=None, block_n=None,
                      single_buffer_consts=True):
    """Pallas forward. x: (B, sequence_len*features) f32, condition: (B,) int32."""
    f32, bf16 = jnp.float32, jnp.bfloat16
    B = x.shape[0]
    input_size = params["w1x"].shape[0]
    d1 = params["w1x"].shape[1]          # 2 * input_size
    d2 = params["w2"].shape[1]           # 4 * input_size
    d3 = params["w3"].shape[1]           # 8 * input_size
    out_features = params["w5"].shape[1]

    # ---- pad every matmul dim to a lane multiple (zero-padding is semantics-free:
    # lrelu(0)=0 and padded weight rows/cols are zero).
    LANE = 128
    I = _round_up(input_size, LANE)
    D1 = _round_up(d1, LANE)
    D2 = _round_up(d2, LANE)
    D3 = _round_up(d3, LANE)
    OUT = _round_up(out_features, LANE)

    vmem_cap = _vmem_capacity_bytes()
    budget = max(32 << 20, vmem_cap - (20 << 20))   # physical VMEM minus headroom

    # ---- batch tile: primary tuning knob.  Streamed-weight arithmetic intensity
    # ~= batch_tile flops/byte vs ridge points ~240/680/310 (v5e/v6e/v7x).
    auto_bt = batch_tile is None
    if auto_bt:
        target = 512 if vmem_cap > (96 << 20) else 256   # 128 MiB chips vs v7x
        batch_tile = min(target, _round_up(B, 8))
        # Keep >= 2 batch tiles so the "parallel" axis can feed both v7x cores.
        if B > 8 and _round_up(B, batch_tile) // batch_tile == 1:
            batch_tile = _round_up((B + 1) // 2, 8)
    batch_tile = _round_up(batch_tile, 8)

    # ---- VMEM accounting: 2x only for blocks whose index varies, 1x for
    # single-buffered constant weights, plus scratch and slack.
    def _needed(bt, bn, single):
        nbuf_const = 1 if single else 2
        varying = (_nbytes((bt, I), bf16) + _nbytes((bt, D1), bf16)
                   + _nbytes((D2, bn), bf16) + _nbytes((1, bn), f32)
                   + _nbytes((bn, D2), bf16)
                   + _nbytes((bt, OUT), f32))
        const = (_nbytes((I, D1), bf16) + _nbytes((D1, D2), bf16)
                 + 2 * _nbytes((1, D2), f32)
                 + _nbytes((D2, OUT), bf16) + _nbytes((1, OUT), f32))
        scratch = _nbytes((bt, D2), bf16) + _nbytes((bt, D2), f32)
        return 2 * varying + nbuf_const * const + scratch + (4 << 20)

    # ---- k-axis tiling of the 8I dim shared by w3 (N) and w4 (K).  Prefer a
    # single step (no k grid) when it fits; otherwise 1024/512/256/128 blocks.
    if block_n is None:
        cands = [D3] + [c for c in (1024, 512, 256, 128) if c < D3 and D3 % c == 0]
        block_n = cands[-1]
        for c in cands:
            if _needed(batch_tile, c, single_buffer_consts) <= budget:
                block_n = c
                break
    assert D3 % block_n == 0 and block_n % 128 == 0, (D3, block_n)
    nk = D3 // block_n

    if auto_bt:
        while _needed(batch_tile, block_n, single_buffer_consts) > budget and batch_tile > 64:
            batch_tile = _round_up(batch_tile // 2, 8)

    B_pad = _round_up(B, batch_tile)
    nb = B_pad // batch_tile

    # ---- embedding folded out: onehot(c) @ emb @ w1e == (emb @ w1e)[c]; b1 folded
    # into the same per-row bias and shipped bf16 (added into an f32 accumulator).
    emb_w1 = jnp.dot(params["emb"].astype(f32), params["w1e"].astype(f32))
    cond_p = jnp.zeros((B_pad,), dtype=condition.dtype).at[:B].set(condition)
    eb = (emb_w1[cond_p] + params["b1"]).astype(bf16)            # (B_pad, d1) bf16
    eb_p = _pad2(eb, B_pad, D1, bf16)

    x_p = _pad2(x, B_pad, I, bf16)
    w1x = _pad2(params["w1x"], I, D1, bf16)
    w2 = _pad2(params["w2"], D1, D2, bf16)
    b2 = _pad2(params["b2"], 1, D2, f32)
    w3 = _pad2(params["w3"], D2, D3, bf16)
    b3 = _pad2(params["b3"], 1, D3, f32)
    w4 = _pad2(params["w4"], D3, D2, bf16)
    b4 = _pad2(params["b4"], 1, D2, f32)
    w5 = _pad2(params["w5"], D2, OUT, bf16)
    b5 = _pad2(params["b5"], 1, OUT, f32)

    inputs = (x_p, eb_p, w1x, w2, b2, w3, b3, w4, b4, w5, b5)

    def _run(use_pipeline_modes):
        single = use_pipeline_modes and single_buffer_consts
        const_kw = dict(pipeline_mode=pl.Buffered(1)) if single else {}
        # Deeper buffering on the streamed blocks when the k loop is DMA-exposed
        # (small batch tile => low arithmetic intensity).
        use_stream3 = use_pipeline_modes and nk > 1 and batch_tile < 128
        stream_kw = dict(pipeline_mode=pl.Buffered(3)) if use_stream3 else {}
        cmap = lambda b, k: (0, 0)

        in_specs = [
            pl.BlockSpec((batch_tile, I), lambda b, k: (b, 0)),            # x
            pl.BlockSpec((batch_tile, D1), lambda b, k: (b, 0)),           # emb+b1 bias
            pl.BlockSpec((I, D1), cmap, **const_kw),                       # w1x
            pl.BlockSpec((D1, D2), cmap, **const_kw),                      # w2
            pl.BlockSpec((1, D2), cmap, **const_kw),                       # b2
            pl.BlockSpec((D2, block_n), lambda b, k: (0, k), **stream_kw),  # w3 N-blk
            pl.BlockSpec((1, block_n), lambda b, k: (0, k), **stream_kw),   # b3 N-blk
            pl.BlockSpec((block_n, D2), lambda b, k: (k, 0), **stream_kw),  # w4 K-blk
            pl.BlockSpec((1, D2), cmap, **const_kw),                       # b4
            pl.BlockSpec((D2, OUT), cmap, **const_kw),                     # w5
            pl.BlockSpec((1, OUT), cmap, **const_kw),                      # b5
        ]
        out_spec = pl.BlockSpec((batch_tile, OUT), lambda b, k: (b, 0))

        scratch = [pltpu.VMEM((batch_tile, D2), bf16),    # h2 (layer-2 acts, bf16)
                   pltpu.VMEM((batch_tile, D2), f32)]     # layer-4 accumulator

        needed = _needed(batch_tile, block_n, single)
        if use_stream3:   # one extra streamed w3/b3/w4 buffer
            needed += (_nbytes((D2, block_n), bf16) + _nbytes((1, block_n), f32)
                       + _nbytes((block_n, D2), bf16))
        vmem_limit = int(min(budget, max(32 << 20, needed)))

        flops = 2 * B_pad * (I * D1 + D1 * D2 + D2 * D3 + D3 * D2 + D2 * OUT)
        bytes_accessed = (sum(_nbytes(a.shape, a.dtype) for a in inputs)
                          + _nbytes((B_pad, OUT), f32))
        cost = pl.CostEstimate(flops=flops, transcendentals=B_pad * OUT,
                               bytes_accessed=bytes_accessed)

        return pl.pallas_call(
            discriminator_kernel,
            out_shape=jax.ShapeDtypeStruct((B_pad, OUT), f32),
            grid_spec=pltpu.PrefetchScalarGridSpec(
                num_scalar_prefetch=0,
                grid=(nb, nk),
                in_specs=in_specs,
                out_specs=out_spec,
                scratch_shapes=scratch),
            compiler_params=pltpu.CompilerParams(
                dimension_semantics=("parallel", "arbitrary"),
                vmem_limit_bytes=vmem_limit),
            cost_estimate=cost,
        )(*inputs)

    try:
        out = _run(True)
    except Exception:
        # pipeline_mode=pl.Buffered unsupported on this jax/libtpu -> default
        # double-buffering (correctness unaffected).
        out = _run(False)
    return out[:B, :out_features]


def reference_forward(x, condition, params):
    """Pure-JAX reference mirroring the kernel's bf16/f32 math (eval-mode dropout)."""
    f32, bf16 = jnp.float32, jnp.bfloat16
    up = lambda a: a.astype(f32)
    lrelu = lambda v: jnp.where(v >= 0, v, 0.01 * v)

    emb_w1 = up(params["emb"]) @ up(params["w1e"])
    eb = up((emb_w1[condition] + params["b1"]).astype(bf16))     # fused bf16 bias
    h = lrelu(up(x.astype(bf16)) @ up(params["w1x"]) + eb)
    h = lrelu(up(h.astype(bf16)) @ up(params["w2"]) + params["b2"])
    h = h.astype(bf16)                                           # bf16 h2 scratch
    h = lrelu(up(h) @ up(params["w3"]) + params["b3"])
    h = lrelu(up(h.astype(bf16)) @ up(params["w4"]) + params["b4"])
    z = up(h.astype(bf16)) @ up(params["w5"]) + params["b5"]
    return jax.nn.sigmoid(z)


if __name__ == "__main__":
    # Small shapes consistent with the module: input_size = sequence_len * features.
    features, sequence_len, conditions, embeddings, out_features = 4, 8, 6, 8, 1
    batch = 32
    input_size = sequence_len * features   # 32 -> hidden dims 64/128/256/128

    key = jax.random.PRNGKey(0)
    kx, kc, kp = jax.random.split(key, 3)
    x = jax.random.normal(kx, (batch, input_size), dtype=jnp.float32)
    condition = jax.random.randint(kc, (batch,), 0, conditions, dtype=jnp.int32)
    params = init_params(kp, features, sequence_len, conditions, embeddings,
                         out_features)

    # batch_tile=16 / block_n=128 -> grid (2, 2): exercises the parallel batch
    # axis, the streamed w3/w4 k-loop, the layer-4 accumulator, and the buffered
    # const/stream specs even at this small size.
    out = discriminator_fnn(x, condition, params, batch_tile=16, block_n=128)
    out = jax.block_until_ready(out)

    ref = reference_forward(x, condition, params)
    assert out.shape == (batch, out_features), out.shape
    err = float(jnp.max(jnp.abs(out - ref)))
    assert err < 2e-2, (err, out, ref)

    print("KERNEL_OK")
</pallas_src>

<mosaic_0001>
module attributes {stable_mosaic.version = 11 : i64} {
  func.func @discriminator_kernel(%arg0: i32, %arg1: i32, %arg2: memref<16x128xbf16, #tpu.memory_space<vmem>>, %arg3: memref<16x128xbf16, #tpu.memory_space<vmem>>, %arg4: memref<128x128xbf16, #tpu.memory_space<vmem>>, %arg5: memref<128x128xbf16, #tpu.memory_space<vmem>>, %arg6: memref<1x128xf32, #tpu.memory_space<vmem>>, %arg7: memref<128x128xbf16, #tpu.memory_space<vmem>>, %arg8: memref<1x128xf32, #tpu.memory_space<vmem>>, %arg9: memref<128x128xbf16, #tpu.memory_space<vmem>>, %arg10: memref<1x128xf32, #tpu.memory_space<vmem>>, %arg11: memref<128x128xbf16, #tpu.memory_space<vmem>>, %arg12: memref<1x128xf32, #tpu.memory_space<vmem>>, %arg13: memref<16x128xf32, #tpu.memory_space<vmem>>, %arg14: memref<16x128xbf16, #tpu.memory_space<vmem>>, %arg15: memref<16x128xf32, #tpu.memory_space<vmem>>) attributes {dimension_semantics = [#tpu.dimension_semantics<parallel>, #tpu.dimension_semantics<arbitrary>], iteration_bounds = array<i64: 2, 2>, scalar_prefetch = 0 : i64, scratch_operands = 2 : i64, tpu.core_type = #tpu.core_type<tc>, window_params = [{transform_indices = @transform_0, window_bounds = array<i64: 16, 128>}, {transform_indices = @transform_1, window_bounds = array<i64: 16, 128>}, {pipeline_mode = #tpu.pipeline_mode<synchronous>, transform_indices = @transform_2, window_bounds = array<i64: 128, 128>}, {pipeline_mode = #tpu.pipeline_mode<synchronous>, transform_indices = @transform_3, window_bounds = array<i64: 128, 128>}, {pipeline_mode = #tpu.pipeline_mode<synchronous>, transform_indices = @transform_4, window_bounds = array<i64: 1, 128>}, {transform_indices = @transform_5, window_bounds = array<i64: 128, 128>}, {transform_indices = @transform_6, window_bounds = array<i64: 1, 128>}, {transform_indices = @transform_7, window_bounds = array<i64: 128, 128>}, {pipeline_mode = #tpu.pipeline_mode<synchronous>, transform_indices = @transform_8, window_bounds = array<i64: 1, 128>}, {pipeline_mode = #tpu.pipeline_mode<synchronous>, transform_indices = @transform_9, window_bounds = array<i64: 128, 128>}, {pipeline_mode = #tpu.pipeline_mode<synchronous>, transform_indices = @transform_10, window_bounds = array<i64: 1, 128>}, {transform_indices = @transform_11, window_bounds = array<i64: 16, 128>}]} {
    %c0_i32 = arith.constant 0 : i32
    %0 = arith.cmpi eq, %arg1, %c0_i32 : i32
    %1 = arith.extui %0 : i1 to i32
    %c0_i32_0 = arith.constant 0 : i32
    %2 = arith.cmpi ne, %1, %c0_i32_0 : i32
    scf.if %2 {
      %c0_16 = arith.constant 0 : index
      %c0_17 = arith.constant 0 : index
      %23 = vector.load %arg2[%c0_16, %c0_17] : memref<16x128xbf16, #tpu.memory_space<vmem>>, vector<16x128xbf16>
      %c0_18 = arith.constant 0 : index
      %c0_19 = arith.constant 0 : index
      %24 = vector.load %arg4[%c0_18, %c0_19] : memref<128x128xbf16, #tpu.memory_space<vmem>>, vector<128x128xbf16>
      %cst_20 = arith.constant dense<0.000000e+00> : vector<16x128xf32>
      %25 = tpu.matmul %23, %24, %cst_20 {dimension_numbers = #tpu.dot_dimension_numbers<[1], [0], [0], [1], [0, 0, 1, 1], [], []>} : vector<16x128xbf16>, vector<128x128xbf16>, vector<16x128xf32> -> vector<16x128xf32>
      %c0_21 = arith.constant 0 : index
      %c0_22 = arith.constant 0 : index
      %26 = vector.load %arg3[%c0_21, %c0_22] : memref<16x128xbf16, #tpu.memory_space<vmem>>, vector<16x128xbf16>
      %27 = arith.extf %26 : vector<16x128xbf16> to vector<16x128xf32>
      %28 = arith.addf %25, %27 : vector<16x128xf32>
      %cst_23 = arith.constant 0.000000e+00 : f32
      %29 = vector.broadcast %cst_23 : f32 to vector<16x128xf32>
      %30 = arith.cmpf oge, %28, %29 : vector<16x128xf32>
      %cst_24 = arith.constant 0.00999999977 : f32
      %31 = vector.broadcast %cst_24 : f32 to vector<16x128xf32>
      %32 = arith.mulf %31, %28 : vector<16x128xf32>
      %33 = arith.select %30, %28, %32 : vector<16x128xi1>, vector<16x128xf32>
      %34 = arith.truncf %33 : vector<16x128xf32> to vector<16x128xbf16>
      %c0_25 = arith.constant 0 : index
      %c0_26 = arith.constant 0 : index
      %35 = vector.load %arg5[%c0_25, %c0_26] : memref<128x128xbf16, #tpu.memory_space<vmem>>, vector<128x128xbf16>
      %cst_27 = arith.constant dense<0.000000e+00> : vector<16x128xf32>
      %36 = tpu.matmul %34, %35, %cst_27 {dimension_numbers = #tpu.dot_dimension_numbers<[1], [0], [0], [1], [0, 0, 1, 1], [], []>} : vector<16x128xbf16>, vector<128x128xbf16>, vector<16x128xf32> -> vector<16x128xf32>
      %c0_28 = arith.constant 0 : index
      %c0_29 = arith.constant 0 : index
      %37 = vector.load %arg6[%c0_28, %c0_29] : memref<1x128xf32, #tpu.memory_space<vmem>>, vector<1x128xf32>
      %38 = vector.broadcast %37 : vector<1x128xf32> to vector<16x128xf32>
      %39 = arith.addf %36, %38 : vector<16x128xf32>
      %cst_30 = arith.constant 0.000000e+00 : f32
      %40 = vector.broadcast %cst_30 : f32 to vector<16x128xf32>
      %41 = arith.cmpf oge, %39, %40 : vector<16x128xf32>
      %cst_31 = arith.constant 0.00999999977 : f32
      %42 = vector.broadcast %cst_31 : f32 to vector<16x128xf32>
      %43 = arith.mulf %42, %39 : vector<16x128xf32>
      %44 = arith.select %41, %39, %43 : vector<16x128xi1>, vector<16x128xf32>
      %45 = arith.truncf %44 : vector<16x128xf32> to vector<16x128xbf16>
      %c0_32 = arith.constant 0 : index
      %c0_33 = arith.constant 0 : index
      %46 = vector.load %arg14[%c0_32, %c0_33] : memref<16x128xbf16, #tpu.memory_space<vmem>>, vector<16x128xbf16>
      tpu.vector_store %arg14[%c0_32, %c0_33], %45 {strides = array<i32>} : memref<16x128xbf16, #tpu.memory_space<vmem>>, vector<16x128xbf16>,
      %cst_34 = arith.constant 0.000000e+00 : f32
      %47 = vector.broadcast %cst_34 : f32 to vector<16x128xf32>
      %c0_35 = arith.constant 0 : index
      %c0_36 = arith.constant 0 : index
      %48 = vector.load %arg15[%c0_35, %c0_36] : memref<16x128xf32, #tpu.memory_space<vmem>>, vector<16x128xf32>
      tpu.vector_store %arg15[%c0_35, %c0_36], %47 {strides = array<i32>} : memref<16x128xf32, #tpu.memory_space<vmem>>, vector<16x128xf32>,
      %cst_37 = arith.constant 0.000000e+00 : f32
      %49 = vector.broadcast %cst_37 : f32 to vector<16x128xf32>
      %c0_38 = arith.constant 0 : index
      %c0_39 = arith.constant 0 : index
      %50 = vector.load %arg13[%c0_38, %c0_39] : memref<16x128xf32, #tpu.memory_space<vmem>>, vector<16x128xf32>
      tpu.vector_store %arg13[%c0_38, %c0_39], %49 {strides = array<i32>} : memref<16x128xf32, #tpu.memory_space<vmem>>, vector<16x128xf32>,
    } else {
    }
    %c0 = arith.constant 0 : index
    %c0_1 = arith.constant 0 : index
    %3 = vector.load %arg14[%c0, %c0_1] : memref<16x128xbf16, #tpu.memory_space<vmem>>, vector<16x128xbf16>
    %c0_2 = arith.constant 0 : index
    %c0_3 = arith.constant 0 : index
    %4 = vector.load %arg7[%c0_2, %c0_3] : memref<128x128xbf16, #tpu.memory_space<vmem>>, vector<128x128xbf16>
    %cst = arith.constant dense<0.000000e+00> : vector<16x128xf32>
    %5 = tpu.matmul %3, %4, %cst {dimension_numbers = #tpu.dot_dimension_numbers<[1], [0], [0], [1], [0, 0, 1, 1], [], []>} : vector<16x128xbf16>, vector<128x128xbf16>, vector<16x128xf32> -> vector<16x128xf32>
    %c0_4 = arith.constant 0 : index
    %c0_5 = arith.constant 0 : index
    %6 = vector.load %arg8[%c0_4, %c0_5] : memref<1x128xf32, #tpu.memory_space<vmem>>, vector<1x128xf32>
    %7 = vector.broadcast %6 : vector<1x128xf32> to vector<16x128xf32>
    %8 = arith.addf %5, %7 : vector<16x128xf32>
    %cst_6 = arith.constant 0.000000e+00 : f32
    %9 = vector.broadcast %cst_6 : f32 to vector<16x128xf32>
    %10 = arith.cmpf oge, %8, %9 : vector<16x128xf32>
    %cst_7 = arith.constant 0.00999999977 : f32
    %11 = vector.broadcast %cst_7 : f32 to vector<16x128xf32>
    %12 = arith.mulf %11, %8 : vector<16x128xf32>
    %13 = arith.select %10, %8, %12 : vector<16x128xi1>, vector<16x128xf32>
    %c0_8 = arith.constant 0 : index
    %c0_9 = arith.constant 0 : index
    %14 = vector.load %arg15[%c0_8, %c0_9] : memref<16x128xf32, #tpu.memory_space<vmem>>, vector<16x128xf32>
    %15 = arith.truncf %13 : vector<16x128xf32> to vector<16x128xbf16>
    %c0_10 = arith.constant 0 : index
    %c0_11 = arith.constant 0 : index
    %16 = vector.load %arg9[%c0_10, %c0_11] : memref<128x128xbf16, #tpu.memory_space<vmem>>, vector<128x128xbf16>
    %cst_12 = arith.constant dense<0.000000e+00> : vector<16x128xf32>
    %17 = tpu.matmul %15, %16, %cst_12 {dimension_numbers = #tpu.dot_dimension_numbers<[1], [0], [0], [1], [0, 0, 1, 1], [], []>} : vector<16x128xbf16>, vector<128x128xbf16>, vector<16x128xf32> -> vector<16x128xf32>
    %18 = arith.addf %14, %17 : vector<16x128xf32>
    %c0_13 = arith.constant 0 : index
    %c0_14 = arith.constant 0 : index
    %19 = vector.load %arg15[%c0_13, %c0_14] : memref<16x128xf32, #tpu.memory_space<vmem>>, vector<16x128xf32>
    tpu.vector_store %arg15[%c0_13, %c0_14], %18 {strides = array<i32>} : memref<16x128xf32, #tpu.memory_space<vmem>>, vector<16x128xf32>,
    %c1_i32 = arith.constant 1 : i32
    %20 = arith.cmpi eq, %arg1, %c1_i32 : i32
    %21 = arith.extui %20 : i1 to i32
    %c0_i32_15 = arith.constant 0 : i32
    %22 = arith.cmpi ne, %21, %c0_i32_15 : i32
    scf.if %22 {
      %c0_16 = arith.constant 0 : index
      %c0_17 = arith.constant 0 : index
      %23 = vector.load %arg15[%c0_16, %c0_17] : memref<16x128xf32, #tpu.memory_space<vmem>>, vector<16x128xf32>
      %c0_18 = arith.constant 0 : index
      %c0_19 = arith.constant 0 : index
      %24 = vector.load %arg10[%c0_18, %c0_19] : memref<1x128xf32, #tpu.memory_space<vmem>>, vector<1x128xf32>
      %25 = vector.broadcast %24 : vector<1x128xf32> to vector<16x128xf32>
      %26 = arith.addf %23, %25 : vector<16x128xf32>
      %cst_20 = arith.constant 0.000000e+00 : f32
      %27 = vector.broadcast %cst_20 : f32 to vector<16x128xf32>
      %28 = arith.cmpf oge, %26, %27 : vector<16x128xf32>
      %cst_21 = arith.constant 0.00999999977 : f32
      %29 = vector.broadcast %cst_21 : f32 to vector<16x128xf32>
      %30 = arith.mulf %29, %26 : vector<16x128xf32>
      %31 = arith.select %28, %26, %30 : vector<16x128xi1>, vector<16x128xf32>
      %32 = arith.truncf %31 : vector<16x128xf32> to vector<16x128xbf16>
      %c0_22 = arith.constant 0 : index
      %c0_23 = arith.constant 0 : index
      %33 = vector.load %arg11[%c0_22, %c0_23] : memref<128x128xbf16, #tpu.memory_space<vmem>>, vector<128x128xbf16>
      %cst_24 = arith.constant dense<0.000000e+00> : vector<16x128xf32>
      %34 = tpu.matmul %32, %33, %cst_24 {dimension_numbers = #tpu.dot_dimension_numbers<[1], [0], [0], [1], [0, 0, 1, 1], [], []>} : vector<16x128xbf16>, vector<128x128xbf16>, vector<16x128xf32> -> vector<16x128xf32>
      %c0_25 = arith.constant 0 : index
      %c0_26 = arith.constant 0 : index
      %35 = vector.load %arg12[%c0_25, %c0_26] : memref<1x128xf32, #tpu.memory_space<vmem>>, vector<1x128xf32>
      %36 = vector.broadcast %35 : vector<1x128xf32> to vector<16x128xf32>
      %37 = arith.addf %34, %36 : vector<16x128xf32>
      %38 = math.absf %37 : vector<16x128xf32>
      %cst_27 = arith.constant 0.000000e+00 : f32
      %39 = vector.broadcast %cst_27 : f32 to vector<16x128xf32>
      %40 = arith.subf %39, %38 : vector<16x128xf32>
      %41 = math.exp %40 : vector<16x128xf32>
      %cst_28 = arith.constant 0.000000e+00 : f32
      %42 = vector.broadcast %cst_28 : f32 to vector<16x128xf32>
      %43 = arith.cmpf oge, %37, %42 : vector<16x128xf32>
      %cst_29 = arith.constant 1.000000e+00 : f32
      %44 = vector.broadcast %cst_29 : f32 to vector<16x128xf32>
      %45 = arith.select %43, %44, %41 : vector<16x128xi1>, vector<16x128xf32>
      %cst_30 = arith.constant 1.000000e+00 : f32
      %46 = vector.broadcast %cst_30 : f32 to vector<16x128xf32>
      %47 = arith.addf %46, %41 : vector<16x128xf32>
      %48 = arith.divf %45, %47 : vector<16x128xf32>
      %c0_31 = arith.constant 0 : index
      %c0_32 = arith.constant 0 : index
      %49 = vector.load %arg13[%c0_31, %c0_32] : memref<16x128xf32, #tpu.memory_space<vmem>>, vector<16x128xf32>
      tpu.vector_store %arg13[%c0_31, %c0_32], %48 {strides = array<i32>} : memref<16x128xf32, #tpu.memory_space<vmem>>, vector<16x128xf32>,
    } else {
    }
    return
  }
  func.func @transform_0(%arg0: i32, %arg1: i32) -> (i32, i32) {
    %c0_i32 = arith.constant 0 : i32
    %c0_i32_0 = arith.constant 0 : i32
    return %arg0, %c0_i32 : i32, i32
  }
  func.func @transform_1(%arg0: i32, %arg1: i32) -> (i32, i32) {
    %c0_i32 = arith.constant 0 : i32
    %c0_i32_0 = arith.constant 0 : i32
    return %arg0, %c0_i32 : i32, i32
  }
  func.func @transform_2(%arg0: i32, %arg1: i32) -> (i32, i32) {
    %c0_i32 = arith.constant 0 : i32
    %c0_i32_0 = arith.constant 0 : i32
    %c0_i32_1 = arith.constant 0 : i32
    return %c0_i32, %c0_i32_0 : i32, i32
  }
  func.func @transform_3(%arg0: i32, %arg1: i32) -> (i32, i32) {
    %c0_i32 = arith.constant 0 : i32
    %c0_i32_0 = arith.constant 0 : i32
    %c0_i32_1 = arith.constant 0 : i32
    return %c0_i32, %c0_i32_0 : i32, i32
  }
  func.func @transform_4(%arg0: i32, %arg1: i32) -> (i32, i32) {
    %c0_i32 = arith.constant 0 : i32
    %c0_i32_0 = arith.constant 0 : i32
    %c0_i32_1 = arith.constant 0 : i32
    return %c0_i32, %c0_i32_0 : i32, i32
  }
  func.func @transform_5(%arg0: i32, %arg1: i32) -> (i32, i32) {
    %c0_i32 = arith.constant 0 : i32
    %c0_i32_0 = arith.constant 0 : i32
    return %c0_i32, %arg1 : i32, i32
  }
  func.func @transform_6(%arg0: i32, %arg1: i32) -> (i32, i32) {
    %c0_i32 = arith.constant 0 : i32
    %c0_i32_0 = arith.constant 0 : i32
    return %c0_i32, %arg1 : i32, i32
  }
  func.func @transform_7(%arg0: i32, %arg1: i32) -> (i32, i32) {
    %c0_i32 = arith.constant 0 : i32
    %c0_i32_0 = arith.constant 0 : i32
    return %arg1, %c0_i32 : i32, i32
  }
  func.func @transform_8(%arg0: i32, %arg1: i32) -> (i32, i32) {
    %c0_i32 = arith.constant 0 : i32
    %c0_i32_0 = arith.constant 0 : i32
    %c0_i32_1 = arith.constant 0 : i32
    return %c0_i32, %c0_i32_0 : i32, i32
  }
  func.func @transform_9(%arg0: i32, %arg1: i32) -> (i32, i32) {
    %c0_i32 = arith.constant 0 : i32
    %c0_i32_0 = arith.constant 0 : i32
    %c0_i32_1 = arith.constant 0 : i32
    return %c0_i32, %c0_i32_0 : i32, i32
  }
  func.func @transform_10(%arg0: i32, %arg1: i32) -> (i32, i32) {
    %c0_i32 = arith.constant 0 : i32
    %c0_i32_0 = arith.constant 0 : i32
    %c0_i32_1 = arith.constant 0 : i32
    return %c0_i32, %c0_i32_0 : i32, i32
  }
  func.func @transform_11(%arg0: i32, %arg1: i32) -> (i32, i32) {
    %c0_i32 = arith.constant 0 : i32
    %c0_i32_0 = arith.constant 0 : i32
    return %arg0, %c0_i32 : i32, i32
  }
}

</mosaic_0001>

<bundles_post_ra>
// kernel: tpu_custom_call.1
= control target key start
LH: loop header
LB: loop body
LE: loop exit
PB: predicated region body
PF: predicated region fallthrough
CT: control target
= control target key end

     0   :  { %s2530_s0 = inlined_call_operand.hbm [shape: bf16[32,128], index: 0, kind: input, shape index: {}]   ;;  %s2531_s1 = inlined_call_operand.hbm [shape: bf16[32,128], index: 1, kind: input, shape index: {}]   ;;  %s2532_s2 = inlined_call_operand.hbm [shape: bf16[128,128], index: 2, kind: input, shape index: {}]   ;;  %s2533_s3 = inlined_call_operand.hbm [shape: bf16[128,128], index: 3, kind: input, shape index: {}]   ;;  %s2534_s4 = inlined_call_operand.vmem [shape: f32[1,128], index: 4, kind: input, shape index: {}]   ;;  %s2535_s5 = inlined_call_operand.hbm [shape: bf16[128,256], index: 5, kind: input, shape index: {}]   ;;  %s2536_s6 = inlined_call_operand.vmem [shape: f32[1,256], index: 6, kind: input, shape index: {}]   ;;  %s2537_s7 = inlined_call_operand.hbm [shape: bf16[256,128], index: 7, kind: input, shape index: {}]   ;;  %s2538_s8 = inlined_call_operand.vmem [shape: f32[1,128], index: 8, kind: input, shape index: {}]   ;;  %s2539_s9 = inlined_call_operand.hbm [shape: bf16[128,128], index: 9, kind: input, shape index: {}]   ;;  %s2540_s10 = inlined_call_operand.vmem [shape: f32[1,128], index: 10, kind: input, shape index: {}]   ;;  %s2541_s11 = inlined_call_operand.hbm [shape: f32[32,128], index: 11, kind: output, shape index: {}]  }
   0x1   :  { %2562 = sst [smem:[#allocation35_spill]] %s2530_s0 }
   0x2   :  { %2563 = sst [smem:[#allocation36_spill]] %s2532_s2 }
   0x3   :  { %2564 = sst [smem:[#allocation37_spill]] %s2533_s3 }
   0x4   :  { %2565 = sst [smem:[#allocation38_spill]] %s2534_s4 }
   0x5   :  { %2566 = sst [smem:[#allocation39_spill]] %s2536_s6 }
   0x6   :  { %2567 = sst [smem:[#allocation40_spill]] %s2538_s8 }
   0x7   :  { %2568 = sst [smem:[#allocation41_spill]] %s2540_s10 }
   0x8   :  { %2569 = sst [smem:[#allocation42_spill]] %s2541_s11 }
   0x9   :  { %16 = vsyncpa [#allocation5], 0 }
   0xa   :  { %18 = vsyncpa [#allocation5 + $0x1], 0 }
   0xb   :  { %19 = vsyncpa [#allocation8], 0 }
   0xc   :  { %21 = vsyncpa [#allocation8 + $0x1], 0 }
   0xd   :  { %22 = vsyncpa [#allocation11], 0 }
   0xe   :  { %23 = vsyncpa [#allocation6], 0 }
   0xf   :  { %25 = vsyncpa [#allocation6 + $0x1], 0  ;;  %s2180_s17 = smov 0   ;;  %s2182_s18 = smov 0  }
  0x10   :  { %s2184_s19 = smov 0   ;;  %s2186_s20 = smov 0  }
  0x11   :  { %s2188_s21 = smov 0   ;;  %s2190_s22 = smov 0  }
  0x12   :  { %s2192_s23 = smov 0   ;;  %s2194_s24 = smov 0  }
  0x13   :  { %s2196_s25 = smov 0   ;;  %s2198_s26 = smov 0  }
  0x14   :  { %s2200_s27 = smov 0  }
  0x15 LB: > { %2570 = sst [smem:[#allocation24_spill]] %s2081_s20  ;;  %s2234_s28 = sadd.s32 4294967295, %s2109_s27   ;;  %s2109_s27 = sphi %s2200_s27, %s31_s27   ;;  %s2105_s26 = sphi %s2198_s26, %s2620_s26   ;;  %s2101_s25 = sphi %s2196_s25, %s2627_s25   ;;  %s2097_s24 = sphi %s2194_s24, %s2618_s24   ;;  %s2093_s23 = sphi %s2192_s23, %s2626_s23   ;;  %s2089_s22 = sphi %s2190_s22, %s2625_s22   ;;  %s2085_s21 = sphi %s2188_s21, %s2624_s21   ;;  %s2081_s20 = sphi %s2186_s20, %s2616_s20   ;;  %s2077_s19 = sphi %s2184_s19, %s2623_s19   ;;  %s2073_s18 = sphi %s2182_s18, %s2622_s18   ;;  %s2069_s17 = sphi %s2180_s17, %s2621_s17  }
  0x16   : > { %2571 = sst [smem:[#allocation25_spill]] %s2085_s21  ;;  %p178_p0 = scmp.ne.s32.totalorder %s2073_s18, %s2069_s17 }
  0x17   : > { %2572 = sst [smem:[#allocation26_spill]] %s2093_s23  ;;  %p2545_p1 = scmp.eq.s32.totalorder %s2234_s28, 0 }
  0x18   : > { %2573 = sst [smem:[#allocation27_spill]] %s2097_s24  ;;  %p317_p2 = scmp.eq.s32.totalorder %s2234_s28, 3 }
  0x19   : > { %2574 = sst [smem:[#allocation28_spill]] %s2105_s26  ;;  %p1332_p3 = scmp.ge.s32.totalorder %s2109_s27, 1 }
  0x1a   : > { %p330_p4 = scmp.lt.s32.totalorder %s2109_s27, 5  ;;  %p2243_p5 = por %p178_p0, %p2545_p1 }
  0x1b   : > { %s2578_s2 = sld [smem:[#allocation36_spill]]  ;;  %s2111_s15 = smov [#allocation9]  }
  0x1c   : > { %s2575_s29 = scalar_select %p2243_p5, 1, 0 }
  0x1d   : > { %p2247_p6 = pnand %p1332_p3, %p330_p4  ;;  %s343_s16 = sshll.u32 %s2111_s15, 4  ;;  %s344_s16 = int_to_ptr.vmem [resolvable:$true] %s343_s16 }
  0x1e   : > { %2576 = sst [smem:[#allocation29_spill]] %s2575_s29  ;;  %s2543_s11 = smov 64  }
  0x1f   : > { %p1609_p7 = pneg %p2247_p6  ;;  %s2580_s3 = sld [smem:[#allocation37_spill]] }
  0x20   : > { %s2548_s15 = smov 4   ;;  %s2114_s24 = smov [#allocation10]  }
  0x21   : > { %s341_s14 = sshll.u32 %s2578_s2, 4  ;;  %p2258_p8 = pnand %p1609_p7, %p2545_p1  ;;  %s342_s14 = int_to_ptr.hbm [resolvable:$true] %s341_s14 }
  0x22   : > { %s357_s10 = sshll.u32 %s2114_s24, 4  ;;  %s1331_s12 = sadd.s32 4294967294, %s2109_s27   ;;  %s358_s10 = int_to_ptr.vmem [resolvable:$true] %s357_s10 }
  0x23   : > { %1612 = dma.hbm_to_vmem [thread:$0]  (!%p2258_p8), %s342_s14, 1024, %s344_s16, [#allocation8], %s2543_s11, %s2543_s11, %s2548_s15  }
  0x24   : > { %s40_s13 = sadd.s32 1, %s2101_s25  ;;  %s50_s8 = sadd.s32 1, %s2089_s22 }
  0x25   : > { %s355_s2 = sshll.u32 %s2580_s3, 4  ;;  %s43_s3 = sadd.s32 1, %s2105_s26  ;;  %s356_s2 = int_to_ptr.hbm [resolvable:$true] %s355_s2 }
  0x26   : > { %1615 = dma.hbm_to_vmem [thread:$0]  (!%p2258_p8), %s356_s2, 1024, %s358_s10, [#allocation11], %s2543_s11, %s2543_s11, %s2548_s15  }
  0x27   : > { %p41_p9 = scmp.ge.s32.totalorder %s40_s13, 2  ;;  %p57_p10 = scmp.ne.s32.totalorder %s2089_s22, %s2085_s21 }
  0x28   : > { %p2546_p11 = scmp.eq.s32.totalorder %s2109_s27, 0  ;;  %p63_p13 = scmp.ne.s32.totalorder %s2085_s21, %s2081_s20 }
  0x29   : > { %s2629_s13 = smov (%p41_p9, %s40_s13), 0  ;;  %s2631_s3 = smov (!%p41_p9, %s43_s3), %s2105_s26 }
  0x2a   : > { %2581 = sst [smem:[#allocation30_spill]] %s2629_s13  ;;  %p2287_p12 = por %p2546_p11, %p57_p10 }
  0x2b   : > { %p45_p0 = scmp.ge.s32.totalorder %s2631_s3, 2  ;;  %s162_s10 = ssub.s32 %s2101_s25, %s2629_s13 }
  0x2c   : > { %p2297_p3 = por %p2545_p1, %p63_p13  ;;  %p2301_p4 = scmp.eq.s32.totalorder %s162_s10, 0 }
  0x2d   : > { %s2633_s3 = smov (%p45_p0, %s2631_s3), 0  ;;  %p2309_p7 = por %p317_p2, %p57_p10 }
  0x2e   : > { %s2583_s24 = scalar_select %p2297_p3, 1, 0 }
  0x2f   : > { %2586 = sst [smem:[#allocation32_spill]] %s2633_s3  ;;  %p323_p9 = scmp.eq.s32.totalorder %s1331_s12, 3 }
  0x30   : > { %2584 = sst [smem:[#allocation31_spill]] %s2583_s24  ;;  %s47_s11 = ssub.s32 %s2105_s26, %s2633_s3 }
  0x31   : > { %s2587_s16 = scalar_select %p2309_p7, 1, 0 }
  0x32   : > { %p1639_p1 = scmp.lt.s32.totalorder %s2109_s27, 4  ;;  %p48_p11 = scmp.eq.s32.totalorder %s47_s11, 0 }
  0x33   : > { %2588 = sst [smem:[#allocation33_spill]] %s2587_s16  ;;  %p2316_p5 = por %p323_p9, %p63_p13 }
  0x34   : > { %s394_s10 = sand.u32 1, %s2109_s27   ;;  %s396_s13 = sand.u32 1, %s2089_s22  }
  0x35   : > { %s2323_s20 = scalar_select %p48_p11, %s2089_s22, %s50_s8  }
  0x36   : > { %s1337_s4 = sshll.u32 %s396_s13, 3  ;;  %s1532_s6 = sshll.u32 %s2105_s26, 3 }
  0x37   : > { %2590 = sst [smem:[#allocation34_spill]] %s2323_s20  ;;  %s398_s12 = scalar_lea.vmem [#allocation4], %s1337_s4 }
  0x38   : > { %s2591_s0 = sld [smem:[#allocation35_spill]]  ;;  %s406_s24 = sshll.u32 %s398_s12, 4  ;;  %s407_s24 = int_to_ptr.vmem [resolvable:$true] %s406_s24 }
  0x39   : > { %p1620_p2 = pnand %p1639_p1, %p2287_p12  ;;  %s425_s8 = scalar_lea.hbm %s2531_s1, %s1532_s6 }
  0x3a   : > { %s2336_s13 = scalar_lea.sflag [#allocation5], %s394_s10  ;;  %s2592_s26 = smov 4  }
  0x3b   : > { %s2593_s20 = smov 64   ;;  %s426_s23 = sshll.u32 %s425_s8, 4  ;;  %s427_s23 = int_to_ptr.hbm [resolvable:$true] %s426_s23 }
  0x3c   : > { %s420_s29 = scalar_lea.vmem [#allocation7], %s1337_s4  ;;  %s2342_s3 = scalar_lea.sflag [#allocation8], %s394_s10 }
  0x3d   : > { %s428_s2 = sshll.u32 %s420_s29, 4  ;;  %s1344_s4 = sshll.u32 %s2101_s25, 2  ;;  %s429_s2 = int_to_ptr.vmem [resolvable:$true] %s428_s2 }
  0x3e   : > { %s403_s16 = scalar_lea.hbm %s2591_s0, %s1532_s6  ;;  %s165_s10 = sadd.s32 1, %s2077_s19 }
  0x3f   : > { %s404_s21 = sshll.u32 %s403_s16, 4  ;;  %s2115_s16 = smov [#allocation14]   ;;  %s405_s21 = int_to_ptr.hbm [resolvable:$true] %s404_s21 }
  0x40   : > { %1622 = dma.hbm_to_vmem [thread:$0]  (!%p1620_p2), %s405_s21, 128, %s407_s24, %s2336_s13, %s2593_s20, %s2593_s20, %s2592_s26  }
  0x41   : > { %1625 = dma.hbm_to_vmem [thread:$0]  (!%p1620_p2), %s427_s23, 128, %s429_s2, %s2342_s3, %s2593_s20, %s2593_s20, %s2592_s26  }
  0x42   : > { %s375_s24 = sshll.u32 %s2539_s9, 4  ;;  %s377_s12 = sshll.u32 %s2115_s16, 4  ;;  %s376_s24 = int_to_ptr.hbm [resolvable:$true] %s375_s24  ;;  %s378_s12 = int_to_ptr.vmem [resolvable:$true] %s377_s12 }
  0x43   : > { %1618 = dma.hbm_to_vmem [thread:$0]  (!%p2258_p8), %s376_s24, 1024, %s378_s12, [#allocation11], %s2593_s20, %s2593_s20, %s2592_s26  }
  0x44   : > { %p172_p10 = scmp.ne.s32.totalorder %s2077_s19, %s2073_s18  ;;  %p2594_p11 = scmp.eq.s32.totalorder %s2109_s27, 0 }
  0x45   : > { %s2363_s11 = scalar_select %p2301_p4, %s2077_s19, %s165_s10  }
  0x46   : > { %p174_p12 = por %p172_p10, %p2594_p11  ;;  %s440_s8 = sand.u32 1, %s2077_s19  }
  0x47   : > { %s1343_s23 = sshll.u32 %s440_s8, 6  ;;  %s446_s17 = scalar_lea.hbm %s2535_s5, %s1344_s4 }
  0x48   : > { %s447_s6 = sshll.u32 %s446_s17, 4  ;;  %s442_s21 = scalar_lea.vmem [#allocation12], %s1343_s23  ;;  %s448_s6 = int_to_ptr.hbm [resolvable:$true] %s447_s6 }
  0x49   : > { %s449_s24 = sshll.u32 %s442_s21, 4  ;;  %p1626_p8 = pnand %p1639_p1, %p174_p12  ;;  %s450_s24 = int_to_ptr.vmem [resolvable:$true] %s449_s24 }
  0x4a   : > { %s1534_s16 = sshll.u32 %s2101_s25, 6  ;;  %s2116_s14 = smov 128  }
  0x4b   : > { %1628 = dma.hbm_to_vmem [thread:$0]  (!%p1626_p8), %s448_s6, 1024, %s450_s24, %s2336_s13, %s2116_s14, %s2593_s20, %s2592_s26  }
  0x4c   : > { %s474_s8 = scalar_lea.hbm %s2537_s7, %s1534_s16  ;;  %s469_s0 = scalar_lea.vmem [#allocation13], %s1343_s23 }
  0x4d   : > { %s477_s29 = sshll.u32 %s469_s0, 4  ;;  %s475_s4 = sshll.u32 %s474_s8, 4  ;;  %s478_s29 = int_to_ptr.vmem [resolvable:$true] %s477_s29  ;;  %s476_s4 = int_to_ptr.hbm [resolvable:$true] %s475_s4 }
  0x4e   : > { %1631 = dma.hbm_to_vmem [thread:$0]  (!%p1626_p8), %s476_s4, 1024, %s478_s29, %s2342_s3, %s2593_s20, %s2593_s20, %s2592_s26  }
  0x4f   : > { %489 = sbr.rel (%p2247_p6) target bundleno = 975 (0x3cf), region = 64  ;;  %s2595_s2 = sld [smem:[#allocation25_spill]] (!%p2247_p6) }
  0x50   : > { %s491_s13 = sand.u32 (!%p2247_p6), 1, %s2234_s28  }
  0x51   : > { %s492_s23 = scalar_lea.sflag (!%p2247_p6), [#allocation5], %s491_s13 }
  0x55   : > { %s2388_s6 = sand.u32 1, %s2595_s2  }
  0x56   : > { %s1349_s21 = sshll.u32 %s2388_s6, 3 }
  0x57   : > { %s2391_s0 = scalar_lea.vmem [#allocation4], %s1349_s21 }
  0x58   : > { %2036 = dma.done.wait (%p2297_p3), %s492_s23, 128  }
  0x59   : > { %2038 = vsyncadd (%p2297_p3), %s492_s23, 4294967168  ;;  %s502_s20 = scalar_lea.sflag [#allocation8], %s491_s13  ;;  %s2397_s26 = scalar_lea.vmem [#allocation7], %s1349_s21 }
  0x5a   : > { %2040 = dma.done.wait (%p2297_p3), %s502_s20, 128  }
  0x5b   : > { %2042 = vsyncadd (%p2297_p3), %s502_s20, 4294967168  ;;  %p2597_p1 = scmp.eq.s32.totalorder %s2234_s28, 0 }
  0x5d   : > { %2044 = dma.done.wait (%p2597_p1), [#allocation8], 1024   ;;  %p2598_p6 = pmov %p2597_p1 }
  0x5e   : > { %p2599_p13 = pmov %p2597_p1 }
  0x5f   : > { %2046 = vsyncadd (%p2598_p6), [#allocation8], 4294966272 }
  0x60   : > { %2048 = dma.done.wait (%p2599_p13), [#allocation11], 1024   ;;  %p2600_p0 = pmov %p2597_p1 }
  0x61   : > { %s2601_s30 = sld [smem:[#allocation29_spill]]  ;;  %s523_s3 = sand.u32 1, %s2073_s18  }
  0x62   : > { %2050 = vsyncadd (%p2600_p0), [#allocation11], 4294966272  ;;  %s1353_s24 = sshll.u32 %s523_s3, 6 }
  0x63   : > { %s2412_s16 = scalar_lea.vmem [#allocation12], %s1353_s24 }
  0x67   : > { %p2602_p4 = scmp.ne.s32.totalorder %s2601_s30, 0 }
  0x69   : > { %2052 = dma.done.wait (%p2602_p4), %s492_s23, 1024  }
  0x6a   : > { %2054 = vsyncadd (%p2602_p4), %s492_s23, 4294966272  ;;  %s2418_s14 = scalar_lea.vmem [#allocation13], %s1353_s24 }
  0x6b   : > { %2056 = dma.done.wait (%p2602_p4), %s502_s20, 1024  }
  0x6c   : > { %2058 = vsyncadd (%p2602_p4), %s502_s20, 4294966272  ;;  %p2603_p3 = pmov %p2600_p0 }
  0x6d   : > { %p2604_p9 = pmov %p2600_p0 }
  0x6e   : > { %2060 = dma.done.wait (%p2603_p3), [#allocation11], 1024  }
  0x6f   : > { %2062 = vsyncadd (%p2604_p9), [#allocation11], 4294966272  ;;  %s2605_s12 = sld [smem:[#allocation26_spill]]  ;;  %s1356_s10 = sshll.u32 %s2388_s6, 4 }
  0x70   : > { %s2606_s2 = sld [smem:[#allocation39_spill]]  ;;  %s2437_s13 = scalar_lea.vmem [#allocation15], %s1356_s10 }
  0x75   : > { %p600_p2 = scmp.lt.s32.totalorder %s2605_s12, 1  ;;  %p1357_p10 = scmp.ne.s32.totalorder %s2605_s12, 0 }
  0x76   : > { %s2607_s23 = sld [smem:[#allocation38_spill]] (!%p1357_p10) }
  0x77   : > { %s2431_s8 = scalar_select %p600_p2, %s2605_s12, 1 }
  0x78   : > { %608 = sbr.rel (%p1357_p10) target bundleno = 440 (0x1b8), region = 96 }
  0x79   : > { %s602_s17 = scalar_lea.vmem %s2606_s2, %s2431_s8 }
  0x7d   : > { %v1543_v0 = vld [vmem:[#allocation9 + $0x38] sm:$0xff]  ;;  %v1542_v1 = vld [vmem:[#allocation9 + $0x30] sm:$0xff]  ;;  %v1541_v4 = vld [vmem:[#allocation9 + $0x28] sm:$0xff]  ;;  %v2117_v29 = vmov 0.0  }
  0x7e   : > { %685 = vmatpush.bf16.msra.mxu0 %v1543_v0  ;;  %v1551_v2 = vld [vmem:[#allocation10 + $0x38] sm:$0xff]  ;;  %v1550_v3 = vld [vmem:[#allocation10 + $0x30] sm:$0xff]  ;;  %v1549_v5 = vld [vmem:[#allocation10 + $0x28] sm:$0xff]  ;;  %798 = vst [vmem:[#allocation3] sm:$0xff] %v2117_v29 }
  0x7f   : > { %774 = vmatpush.bf16.msra.mxu1 %v1551_v2  ;;  %v1540_v6 = vld [vmem:[#allocation9 + $0x20] sm:$0xff]  ;;  %v1539_v8 = vld [vmem:[#allocation9 + $0x18] sm:$0xff]  ;;  %v1538_v9 = vld [vmem:[#allocation9 + $0x10] sm:$0xff]  ;;  %799 = vst [vmem:[#allocation3 + $0x8] sm:$0xff] %v2117_v29 }
  0x80   : > { %v1548_v7 = vld [vmem:[#allocation10 + $0x20] sm:$0xff]  ;;  %v1537_v10 = vld [vmem:[#allocation9 + $0x8] sm:$0xff]  ;;  %v1547_v13 = vld [vmem:[#allocation10 + $0x18] sm:$0xff]  ;;  %800 = vst [vmem:[%s2437_s13] sm:$0xff] %v2117_v29 }
  0x81   : > { %v1536_v11 = vld [vmem:[#allocation9] sm:$0xff]  ;;  %v1546_v14 = vld [vmem:[#allocation10 + $0x10] sm:$0xff]  ;;  %v1545_v15 = vld [vmem:[#allocation10 + $0x8] sm:$0xff]  ;;  %801 = vst [vmem:[%s2437_s13 + $0x8] sm:$0xff] %v2117_v29 }
  0x82   : > { %686 = vmatpush.bf16.msra.mxu0 %v1542_v1  ;;  %v1535_v12 = vld [vmem:[%s2391_s0] sm:$0xff]  ;;  %v1579_v17 = vld [vmem:[%s2397_s26] sm:$0xff]  }
  0x83   : > { %775 = vmatpush.bf16.msra.mxu1 %v1550_v3  ;;  %v1544_v16 = vld [vmem:[#allocation10] sm:$0xff]  ;;  %v1580_v19 = vunpack.c.l.bf16 %v1579_v17  ;;  %v1581_v21 = vunpack.c.h.bf16 %v1579_v17  ;;  %v1741_v31 = vld [vmem:[%s2607_s23] ss:$0 sm:$0xff] }
  0x86   : > { %687 = vmatpush.bf16.msra.mxu0 %v1541_v4 }
  0x87   : > { %776 = vmatpush.bf16.msra.mxu1 %v1549_v5 }
  0x8a   : > { %688 = vmatpush.bf16.msra.mxu0 %v1540_v6 }
  0x8b   : > { %777 = vmatpush.bf16.msra.mxu1 %v1548_v7 }
  0x8e   : > { %689 = vmatpush.bf16.msra.mxu0 %v1539_v8 }
  0x8f   : > { %778 = vmatpush.bf16.msra.mxu1 %v1547_v13 }
  0x92   : > { %690 = vmatpush.bf16.msra.mxu0 %v1538_v9 }
  0x93   : > { %779 = vmatpush.bf16.msra.mxu1 %v1546_v14 }
  0x96   : > { %691 = vmatpush.bf16.msra.mxu0 %v1537_v10 }
  0x97   : > { %780 = vmatpush.bf16.msra.mxu1 %v1545_v15 }
  0x9a   : > { %692 = vmatpush.bf16.msra.mxu0 %v1536_v11 }
  0x9b   : > { %781 = vmatpush.bf16.msra.mxu1 %v1544_v16 }
  0x9d   : > { %693 = vmatmul.bf16.vlgmr.msra.gmra.mxu0 %v1535_v12 }
 0x11a   : > { %v694_v18 = vpop.f32.mrf.mxu0 }
 0x11b   : > { %v695_v20 = vadd.f32 %v1580_v19, %v694_v18 }
 0x11d   : > { %v701_v23 = vmul.f32 0.01, %v695_v20  ;;  %vm699_vm0 = vcmp.ge.f32.partialorder %v695_v20, 0.0 }
 0x11f   : > { %v703_v26 = vsel %vm699_vm0, %v695_v20, %v701_v23 }
 0x122   : > { %v696_v22 = vpop.f32.mrf.mxu0 }
 0x123   : > { %v697_v24 = vadd.f32 %v1581_v21, %v696_v22 }
 0x125   : > { %v702_v25 = vmul.f32 0.01, %v697_v24  ;;  %vm700_vm1 = vcmp.ge.f32.partialorder %v697_v24, 0.0 }
 0x127   : > { %v704_v27 = vsel %vm700_vm1, %v697_v24, %v702_v25 }
 0x128   : > { %v705_v28 = vpack.c.bf16 %v704_v27, %v703_v26 }
 0x12a   : > { %782 = vmatmul.bf16.vlgmr.msra.gmra.mxu1 %v705_v28 }
 0x1a7   : > { %v783_v30 = vpop.f32.mrf.mxu1 }
 0x1a8   : > { %v784_v32 = vadd.f32 %v1741_v31, %v783_v30 }
 0x1aa   : > { %v790_v34 = vmul.f32 0.01, %v784_v32  ;;  %vm788_vm2 = vcmp.ge.f32.partialorder %v784_v32, 0.0 }
 0x1ac   : > { %v792_v37 = vsel %vm788_vm2, %v784_v32, %v790_v34 }
 0x1af   : > { %v785_v33 = vpop.f32.mrf.mxu1 }
 0x1b0   : > { %v786_v35 = vadd.f32 %v1741_v31, %v785_v33 }
 0x1b2   : > { %vm789_vm3 = vcmp.ge.f32.partialorder %v786_v35, 0.0  ;;  %v791_v36 = vmul.f32 0.01, %v786_v35 }
 0x1b4   : > { %v793_v38 = vsel %vm789_vm3, %v786_v35, %v791_v36 }
 0x1b5   : > { %v1585_v39 = vpack.c.bf16 %v793_v38, %v792_v37 }
 0x1b7   : > { %1586 = vst [vmem:[#allocation2] sm:$0xff] %v1585_v39  }
 0x1b8 PF: > { %v1560_v40 = vld [vmem:[%s2412_s16 + $0x38] sm:$0xff]  ;;  %v1559_v41 = vld [vmem:[%s2412_s16 + $0x30] sm:$0xff]  ;;  %v1558_v44 = vld [vmem:[%s2412_s16 + $0x28] sm:$0xff]  ;;  %s2609_s30 = sld [smem:[#allocation26_spill]] }
 0x1b9   : > { %878 = vmatpush.bf16.msra.mxu0 %v1560_v40  ;;  %v1568_v42 = vld [vmem:[%s2418_s14 + $0x38] sm:$0xff]  ;;  %v1567_v43 = vld [vmem:[%s2418_s14 + $0x30] sm:$0xff]  ;;  %v1566_v45 = vld [vmem:[%s2418_s14 + $0x28] sm:$0xff] }
 0x1ba   : > { %965 = vmatpush.bf16.msra.mxu1 %v1568_v42  ;;  %v1557_v46 = vld [vmem:[%s2412_s16 + $0x20] sm:$0xff]  ;;  %v1556_v48 = vld [vmem:[%s2412_s16 + $0x18] sm:$0xff]  ;;  %v1555_v49 = vld [vmem:[%s2412_s16 + $0x10] sm:$0xff] }
 0x1bb   : > { %v1565_v47 = vld [vmem:[%s2418_s14 + $0x20] sm:$0xff]  ;;  %v1554_v50 = vld [vmem:[%s2412_s16 + $0x8] sm:$0xff]  ;;  %v1564_v53 = vld [vmem:[%s2418_s14 + $0x18] sm:$0xff] }
 0x1bc   : > { %v1553_v51 = vld [vmem:[%s2412_s16] sm:$0xff]  ;;  %v1563_v54 = vld [vmem:[%s2418_s14 + $0x10] sm:$0xff]  ;;  %v1562_v55 = vld [vmem:[%s2418_s14 + $0x8] sm:$0xff] }
 0x1bd   : > { %879 = vmatpush.bf16.msra.mxu0 %v1559_v41  ;;  %v1561_v56 = vld [vmem:[%s2418_s14] sm:$0xff]  ;;  %v1742_v58 = vld [vmem:[%s602_s17] ss:$0 sm:$0xff]  ;;  %v898_v3 = vld [vmem:[#allocation3] sm:$0xff] }
 0x1be   : > { %966 = vmatpush.bf16.msra.mxu1 %v1567_v43  ;;  %v1552_v52 = vld [vmem:[#allocation2] sm:$0xff]  ;;  %v899_v6 = vld [vmem:[#allocation3 + $0x8] sm:$0xff]  ;;  %p1494_p11 = scmp.ne.s32.totalorder %s2609_s30, 1 }
 0x1bf   : > { %s2610_s16 = sld [smem:[#allocation40_spill]] (!%p1494_p11) }
 0x1c0   : > { %s2611_s10 = sld [smem:[#allocation41_spill]] (!%p1494_p11) }
 0x1c1   : > { %880 = vmatpush.bf16.msra.mxu0 %v1558_v44 }
 0x1c2   : > { %967 = vmatpush.bf16.msra.mxu1 %v1566_v45 }
 0x1c5   : > { %881 = vmatpush.bf16.msra.mxu0 %v1557_v46 }
 0x1c6   : > { %968 = vmatpush.bf16.msra.mxu1 %v1565_v47 }
 0x1c9   : > { %882 = vmatpush.bf16.msra.mxu0 %v1556_v48 }
 0x1ca   : > { %969 = vmatpush.bf16.msra.mxu1 %v1564_v53 }
 0x1cd   : > { %883 = vmatpush.bf16.msra.mxu0 %v1555_v49 }
 0x1ce   : > { %970 = vmatpush.bf16.msra.mxu1 %v1563_v54 }
 0x1d1   : > { %884 = vmatpush.bf16.msra.mxu0 %v1554_v50 }
 0x1d2   : > { %971 = vmatpush.bf16.msra.mxu1 %v1562_v55 }
 0x1d5   : > { %885 = vmatpush.bf16.msra.mxu0 %v1553_v51 }
 0x1d6   : > { %972 = vmatpush.bf16.msra.mxu1 %v1561_v56 }
 0x1d8   : > { %886 = vmatmul.bf16.vlgmr.msra.gmra.mxu0 %v1552_v52 }
 0x255   : > { %v887_v57 = vpop.f32.mrf.mxu0 }
 0x256   : > { %v888_v59 = vadd.f32 %v1742_v58, %v887_v57 }
 0x258   : > { %v894_v61 = vmul.f32 0.01, %v888_v59  ;;  %vm892_vm4 = vcmp.ge.f32.partialorder %v888_v59, 0.0 }
 0x25a   : > { %v896_v0 = vsel %vm892_vm4, %v888_v59, %v894_v61 }
 0x25d   : > { %v889_v60 = vpop.f32.mrf.mxu0 }
 0x25e   : > { %v890_v62 = vadd.f32 %v1742_v58, %v889_v60 }
 0x260   : > { %v895_v63 = vmul.f32 0.01, %v890_v62  ;;  %vm893_vm5 = vcmp.ge.f32.partialorder %v890_v62, 0.0 }
 0x262   : > { %v897_v1 = vsel %vm893_vm5, %v890_v62, %v895_v63 }
 0x263   : > { %v900_v2 = vpack.c.bf16 %v897_v1, %v896_v0 }
 0x265   : > { %973 = vmatmul.bf16.vlgmr.msra.gmra.mxu1 %v900_v2 }
 0x2e2   : > { %v974_v4 = vpop.f32.mrf.mxu1 }
 0x2e3   : > { %v979_v5 = vadd.f32 %v974_v4, %v898_v3 }
 0x2e5   : > { %981 = vst [vmem:[#allocation3] sm:$0xff] %v979_v5 }
 0x2e9   : > { %986 = sbr.rel (%p1494_p11) target bundleno = 953 (0x3b9), region = 100 }
 0x2ea   : > { %v976_v7 = vpop.f32.mrf.mxu1 }
 0x2eb   : > { %v980_v8 = vadd.f32 %v976_v7, %v899_v6 }
 0x2ed   : > { %982 = vst [vmem:[#allocation3 + $0x8] sm:$0xff] %v980_v8 }
 0x2ee   : > { %v1576_v9 = vld [vmem:[#allocation14 + $0x38] sm:$0xff]  ;;  %v1575_v10 = vld [vmem:[#allocation14 + $0x30] sm:$0xff]  ;;  %v1574_v11 = vld [vmem:[#allocation14 + $0x28] sm:$0xff] }
 0x2ef   : > { %1070 = vmatpush.bf16.msra.mxu0 %v1576_v9  ;;  %v1573_v12 = vld [vmem:[#allocation14 + $0x20] sm:$0xff]  ;;  %v1572_v13 = vld [vmem:[#allocation14 + $0x18] sm:$0xff]  ;;  %v1743_v14 = vld [vmem:[%s2610_s16] ss:$0 sm:$0xff] }
 0x2f0   : > { %v987_v15 = vld [vmem:[#allocation3] sm:$0xff]  ;;  %v1570_v20 = vld [vmem:[#allocation14 + $0x8] sm:$0xff]  ;;  %v1569_v23 = vld [vmem:[#allocation14] sm:$0xff] }
 0x2f1   : > { %v1571_v17 = vld [vmem:[#allocation14 + $0x10] sm:$0xff]  ;;  %v993_v18 = vadd.f32 %v1743_v14, %v987_v15  ;;  %v1744_v27 = vld [vmem:[%s2611_s10] ss:$0 sm:$0xff] }
 0x2f3   : > { %1071 = vmatpush.bf16.msra.mxu0 %v1575_v10  ;;  %v997_v21 = vmul.f32 0.01, %v993_v18  ;;  %vm995_vm6 = vcmp.ge.f32.partialorder %v993_v18, 0.0 }
 0x2f4   : > { %v988_v16 = vld [vmem:[#allocation3 + $0x8] sm:$0xff] }
 0x2f5   : > { %v994_v19 = vadd.f32 %v1743_v14, %v988_v16  ;;  %v999_v24 = vsel %vm995_vm6, %v993_v18, %v997_v21 }
 0x2f7   : > { %1072 = vmatpush.bf16.msra.mxu0 %v1574_v11  ;;  %v998_v22 = vmul.f32 0.01, %v994_v19  ;;  %vm996_vm7 = vcmp.ge.f32.partialorder %v994_v19, 0.0 }
 0x2f9   : > { %v1000_v25 = vsel %vm996_vm7, %v994_v19, %v998_v22 }
 0x2fa   : > { %v1001_v26 = vpack.c.bf16 %v1000_v25, %v999_v24 }
 0x2fb   : > { %1073 = vmatpush.bf16.msra.mxu0 %v1573_v12 }
 0x2ff   : > { %1074 = vmatpush.bf16.msra.mxu0 %v1572_v13 }
 0x303   : > { %1075 = vmatpush.bf16.msra.mxu0 %v1571_v17 }
 0x307   : > { %1076 = vmatpush.bf16.msra.mxu0 %v1570_v20 }
 0x30b   : > { %1077 = vmatpush.bf16.msra.mxu0 %v1569_v23 }
 0x30e   : > { %1078 = vmatmul.bf16.vlgmr.msra.gmra.mxu0 %v1001_v26 }
 0x38b   : > { %v1079_v28 = vpop.f32.mrf.mxu0 }
 0x38c   : > { %v1080_v29 = vadd.f32 %v1744_v27, %v1079_v28 }
 0x38e   : > { %v1084_v30 = vand.u32 2147483647, %v1080_v29  ;;  %vm1092_vm11 = vcmp.ge.f32.partialorder %v1080_v29, 0.0 }
 0x390   : > { %v1086_v31 = vsub.f32 0.0, %v1084_v30 }
 0x392   : > { %v1088_v32 = vmul.f32 1.442695, %v1086_v31 }
 0x393   : > { %v1081_v33 = vpop.f32.mrf.mxu0 }
 0x394   : > { %1745 = vpow2.f32 %v1088_v32  ;;  %v1082_v34 = vadd.f32 %v1744_v27, %v1081_v33 }
 0x396   : > { %v1085_v35 = vand.u32 2147483647, %v1082_v34  ;;  %vm1093_vm0 = vcmp.ge.f32.partialorder %v1082_v34, 0.0 }
 0x398   : > { %v1087_v36 = vsub.f32 0.0, %v1085_v35 }
 0x39a   : > { %v1746_v37 = vpop.eup %1745  ;;  %v1090_v38 = vmul.f32 1.442695, %v1087_v36 }
 0x39b   : > { %v1096_v39 = vadd.f32 1.0, %v1746_v37  ;;  %v1094_v53 = vsel %vm1092_vm11, 1.0, %v1746_v37 }
 0x39c   : > { %1747 = vpow2.f32 %v1090_v38 }
 0x39d   : > { %1749 = vrcp.f32 %v1096_v39  ;;  %v1109_v45 = vand.u32 2147483648, %v1096_v39  ;;  %v1107_v47 = vand.u32 2147483647, %v1096_v39  ;;  %vm1103_vm9 = vweird.f32 %v1096_v39 }
 0x39f   : > { %v1110_v50 = vor.u32 1.1754944e-38, %v1109_v45  ;;  %vm1108_vm12 = vcmp.eq.f32.partialorder %v1107_v47, 8.507059e+37 }
 0x3a2   : > { %v1748_v40 = vpop.eup %1747 }
 0x3a3   : > { %v1750_v41 = vpop.eup %1749  ;;  %v1097_v42 = vadd.f32 1.0, %v1748_v40  ;;  %v1095_v63 = vsel %vm1093_vm0, 1.0, %v1748_v40 }
 0x3a4   : > { %v1099_v43 = vmul.f32 %v1750_v41, %v1096_v39  ;;  %vm1104_vm8 = vweird.f32 %v1750_v41 }
 0x3a5   : > { %1751 = vrcp.f32 %v1097_v42  ;;  %vm1105_vm10 = vmor %vm1103_vm9, %vm1104_vm8  ;;  %v1124_v57 = vand.u32 2147483648, %v1097_v42  ;;  %v1122_v59 = vand.u32 2147483647, %v1097_v42  ;;  %vm1118_vm14 = vweird.f32 %v1097_v42 }
 0x3a6   : > { %v1100_v44 = vsub.f32 1.0, %v1099_v43 }
 0x3a7   : > { %v1125_v61 = vor.u32 1.1754944e-38, %v1124_v57  ;;  %vm1123_vm1 = vcmp.eq.f32.partialorder %v1122_v59, 8.507059e+37 }
 0x3a8   : > { %v1101_v46 = vmul.f32 %v1750_v41, %v1100_v44 }
 0x3aa   : > { %v1102_v48 = vadd.f32 %v1750_v41, %v1101_v46 }
 0x3ab   : > { %v1752_v49 = vpop.eup %1751 }
 0x3ac   : > { %v1106_v51 = vsel %vm1105_vm10, %v1750_v41, %v1102_v48  ;;  %v1114_v52 = vmul.f32 %v1752_v49, %v1097_v42  ;;  %vm1119_vm13 = vweird.f32 %v1752_v49 }
 0x3ad   : > { %v1111_v54 = vsel %vm1108_vm12, %v1110_v50, %v1106_v51  ;;  %vm1120_vm15 = vmor %vm1118_vm14, %vm1119_vm13 }
 0x3ae   : > { %v1112_v55 = vmul.f32 %v1111_v54, %v1094_v53  ;;  %v1115_v56 = vsub.f32 1.0, %v1114_v52 }
 0x3b0   : > { %1128 = vst [vmem:[%s2437_s13] sm:$0xff] %v1112_v55  ;;  %v1116_v58 = vmul.f32 %v1752_v49, %v1115_v56 }
 0x3b2   : > { %v1117_v60 = vadd.f32 %v1752_v49, %v1116_v58 }
 0x3b4   : > { %v1121_v62 = vsel %vm1120_vm15, %v1752_v49, %v1117_v60 }
 0x3b5   : > { %v1126_v0 = vsel %vm1123_vm1, %v1125_v61, %v1121_v62 }
 0x3b6   : > { %v1127_v1 = vmul.f32 %v1126_v0, %v1095_v63 }
 0x3b8   : > { %1129 = vst [vmem:[%s2437_s13 + $0x8] sm:$0xff] %v1127_v1 }
 0x3b9 PF: > { %s2612_s8 = sld [smem:[#allocation27_spill]]  ;;  %s1143_s23 = sshll.u32 %s2437_s13, 4  ;;  %s1144_s23 = int_to_ptr.vmem [resolvable:$true] %s1143_s23 }
 0x3ba   : > { %s2614_s28 = sld [smem:[#allocation42_spill]]  ;;  %s1131_s20 = scalar_lea.sflag [#allocation6], %s2388_s6 }
 0x3bf   : > { %s1577_s4 = sshll.u32 %s2612_s8, 4 }
 0x3c0   : > { %s1142_s21 = scalar_lea.hbm %s2614_s28, %s1577_s4  ;;  %s1983_s16 = scalar_lea.hbm %s2614_s28, 32 }
 0x3c1   : > { %s1145_s0 = sshll.u32 %s1142_s21, 4  ;;  %s1146_s0 = int_to_ptr.hbm [resolvable:$true] %s1145_s0 }
 0x3c2   : > { %s1977_s26 = sshra.s32 %s1146_s0, 4  ;;  %s1978_s26 = int_to_ptr.hbm [resolvable:$true] %s1977_s26 }
 0x3c3   : > { %s1979_s30 = scalar_lea.hbm %s1978_s26, 16  ;;  %p1984_p6 = scmp.lt.s32.totalorder %s1978_s26, %s2614_s28 }
 0x3c4   : > { %p1980_p12 = scmp.ne.s32.totalorder %s1978_s26, %s1979_s30  ;;  %p1985_p13 = scmp.lt.s32.totalorder %s1983_s16, %s1979_s30 }
 0x3c6   : > { %p1981_p8 = pnand %p1980_p12, %p2309_p7  ;;  %p1986_p0 = por %p1985_p13, %p1984_p6 }
 0x3c8   : > { %p1982_p1 = pneg %p1981_p8 }
 0x3ca   : > { %p1987_p4 = pnand %p1986_p0, %p1982_p1 }
 0x3cc   : > { %1990 = shalt.err (!%p1987_p4)
}
 0x3cd   : > { %s2118_s6 = smov 128   ;;  %s2119_s13 = smov 8  }
 0x3ce   : > { %1607 = dma.vmem_to_hbm [thread:$0]  (%p2309_p7), %s1144_s23, 256, %s1146_s0, %s1131_s20, %s2118_s6, %s2118_s6, %s2119_s13  }
 0x3cf PF: > { %s2615_s10 = sld [smem:[#allocation24_spill]]  ;;  %p1643_p3 = scmp.ge.s32.totalorder %s2109_s27, 2 }
 0x3d1   : > { %p1633_p9 = pnand %p1643_p3, %p2316_p5 }
 0x3d3   : > { %p1634_p2 = pneg %p1633_p9 }
 0x3d5   : > { %s1160_s8 = sand.u32 1, %s2615_s10  }
 0x3d6   : > { %s1161_s4 = scalar_lea.sflag [#allocation6], %s1160_s8 }
 0x3d7   : > { %2064 = dma.done.wait (%p1634_p2), %s1161_s4, 256  }
 0x3d8   : > { %2066 = vsyncadd (%p1634_p2), %s1161_s4, 4294967040  ;;  %s31_s27 = sadd.s32 1, %s2109_s27   ;;  %s2616_s20 = sld [smem:[#allocation25_spill]] }
 0x3d9   : > { %p28_p10 = scmp.ge.s32.totalorder %s31_s27, 6   ;;  %s2617_s29 = sld [smem:[#allocation34_spill]] }
 0x3da   : > { %s2618_s24 = sld [smem:[#allocation28_spill]]  ;;  %s2621_s17 = smov %s2073_s18 }
 0x3db   : > { %s2619_s2 = sld [smem:[#allocation30_spill]]  ;;  %s2622_s18 = smov %s2077_s19 }
 0x3dc   : > { %s2620_s26 = sld [smem:[#allocation32_spill]]  ;;  %s2623_s19 = smov %s2363_s11 }
 0x3dd   : > { %s2624_s21 = smov %s2089_s22  ;;  %s2626_s23 = smov %s2101_s25 }
 0x3de   :  { %30 = sbr.rel (!%p28_p10) target bundleno = 21 (0x15), region = 167 }
 0x3df   : > { %s2625_s22 = smov %s2617_s29 }
 0x3e1   : > { %s2627_s25 = smov %s2619_s2 }
 0x3e3   :  { %1167 = vsyncpa [#allocation5], 1 }
 0x3e4   :  { %1169 = vsyncpa [#allocation5 + $0x1], 1 }
 0x3e5   :  { %1170 = vsyncpa [#allocation8], 1 }
 0x3e6   :  { %1172 = vsyncpa [#allocation8 + $0x1], 1 }
 0x3e7   :  { %1173 = vsyncpa [#allocation11], 1 }
 0x3e8   :  { %1174 = vsyncpa [#allocation6], 1 }
 0x3e9   :  { %1176 = vsyncpa [#allocation6 + $0x1], 1 }

</bundles_post_ra>
